<compile_context>
chip_gen: v6e
topology: v6e:2x2x1
jax: 0.10.0
libtpu: 0.0.40
codegen_flags: <defaults>
</compile_context>

<pallas_src>
import jax
import jax.numpy as jnp
from jax.experimental import pallas as pl
from jax.experimental.pallas import tpu as pltpu

K_IN = 28 * 28          # 784
H1 = 512
H2 = 256
TM_MAX = 512            # max batch-tile rows (sweepable: 512 / 1024)


def _round_up(v, m):
    return ((v + m - 1) // m) * m


def discriminator_kernel(x_ref, w1_ref, b1_ref, w2_ref, b2_ref, w3_ref, b3_ref,
                         out_ref):
    # x_ref:  (tm, 784)  f32      (cast to bf16 here, not in the wrapper)
    # w1_ref: (784, 512) bf16     w2_ref: (512, 256) bf16
    # b1_ref: (1, 512)   f32      b2_ref: (1, 256)   f32
    # w3_ref: (1, 256)   f32      b3_ref: (1, 1)     f32
    # out_ref:(tm, 1)    f32
    x = x_ref[...].astype(jnp.bfloat16)

    # Linear(784 -> 512) + LeakyReLU(0.2): bf16 MXU inputs, f32 accumulate.
    h1 = jnp.dot(x, w1_ref[...], preferred_element_type=jnp.float32)
    h1 = h1 + b1_ref[...]
    h1 = jnp.maximum(h1, 0.2 * h1)

    # Linear(512 -> 256) + LeakyReLU(0.2)
    h2 = jnp.dot(h1.astype(jnp.bfloat16), w2_ref[...],
                 preferred_element_type=jnp.float32)
    h2 = h2 + b2_ref[...]
    h2 = jnp.maximum(h2, 0.2 * h2)

    # Linear(256 -> 1): VPU multiply + XLU lane reduction.
    out = jnp.sum(h2 * w3_ref[...], axis=-1, keepdims=True) + b3_ref[...]
    out_ref[...] = out.astype(out_ref.dtype)


def _pick_tile(batch):
    """Batch tile: >=2 grid steps for mid/large batches (v7x megacore),
    rounded to 16 rows (bf16 sublane packing), capped at TM_MAX."""
    half = _round_up((batch + 1) // 2, 16)
    return max(1, min(batch, TM_MAX, half))


def discriminator_forward(x, params):
    """x: (B, 1, 28, 28) float32 -> validity (B, 1) float32."""
    B = x.shape[0]
    x_flat = x.reshape(B, K_IN)          # metadata-only reshape, no HBM pass

    w1, b1, w2, b2, w3, b3 = params

    # Weight-side layout prep (tiny, fixed-size; in a real WGAN-GP step these
    # bf16 casts are reused across the real / fake / GP-interpolate passes).
    w1_bf = w1.astype(jnp.bfloat16)
    w2_bf = w2.astype(jnp.bfloat16)
    w3_row = w3.reshape(1, H2).astype(jnp.float32)   # used on the VPU, keep f32
    b1_r = b1.reshape(1, H1).astype(jnp.float32)
    b2_r = b2.reshape(1, H2).astype(jnp.float32)
    b3_r = b3.reshape(1, 1).astype(jnp.float32)

    tm = _pick_tile(B)
    grid = (pl.cdiv(B, tm),)             # partial final block handled by Pallas

    # Weights use a constant index_map -> stay resident in VMEM across tiles.
    const = lambda i: (0, 0)
    out = pl.pallas_call(
        discriminator_kernel,
        out_shape=jax.ShapeDtypeStruct((B, 1), jnp.float32),
        grid=grid,
        in_specs=[
            pl.BlockSpec((tm, K_IN), lambda i: (i, 0)),   # x tiles (pipelined)
            pl.BlockSpec((K_IN, H1), const),              # w1 (resident)
            pl.BlockSpec((1, H1), const),                 # b1
            pl.BlockSpec((H1, H2), const),                # w2
            pl.BlockSpec((1, H2), const),                 # b2
            pl.BlockSpec((1, H2), const),                 # w3 row
            pl.BlockSpec((1, 1), const),                  # b3
        ],
        out_specs=pl.BlockSpec((tm, 1), lambda i: (i, 0)),
        compiler_params=pltpu.CompilerParams(
            dimension_semantics=("parallel",)),
    )(x_flat, w1_bf, b1_r, w2_bf, b2_r, w3_row, b3_r)

    return out


def init_params(key):
    """Deterministic init mimicking nn.Linear default (U[-1/sqrt(fan_in), ...]).

    Weights stored as (in_features, out_features) so the kernel does x @ W.
    Canonical params are f32; the wrapper casts to bf16 for the MXU.
    """
    def linear(key, fan_in, fan_out):
        kw, kb = jax.random.split(key)
        bound = float(fan_in) ** -0.5
        w = jax.random.uniform(kw, (fan_in, fan_out), jnp.float32, -bound, bound)
        b = jax.random.uniform(kb, (fan_out,), jnp.float32, -bound, bound)
        return w, b

    k1, k2, k3 = jax.random.split(key, 3)
    w1, b1 = linear(k1, K_IN, H1)
    w2, b2 = linear(k2, H1, H2)
    w3, b3 = linear(k3, H2, 1)
    return (w1, b1, w2, b2, w3, b3)


def reference_forward(x, params):
    """Pure-JAX reference applying the same bf16 casts as the kernel."""
    w1, b1, w2, b2, w3, b3 = params
    h = x.reshape(x.shape[0], -1)
    h1 = jnp.dot(h.astype(jnp.bfloat16), w1.astype(jnp.bfloat16),
                 preferred_element_type=jnp.float32) + b1
    h1 = jnp.maximum(h1, 0.2 * h1)
    h2 = jnp.dot(h1.astype(jnp.bfloat16), w2.astype(jnp.bfloat16),
                 preferred_element_type=jnp.float32) + b2
    h2 = jnp.maximum(h2, 0.2 * h2)
    return h2 @ w3 + b3


if __name__ == "__main__":
    key = jax.random.PRNGKey(0)
    kx, kp = jax.random.split(key)

    B = 8
    x = jax.random.normal(kx, (B, 1, 28, 28), jnp.float32)  # MNIST-shaped NCHW
    params = init_params(kp)

    out = discriminator_forward(x, params)
    out = jax.block_until_ready(out)

    ref = reference_forward(x, params)
    assert out.shape == (B, 1), out.shape
    max_err = float(jnp.max(jnp.abs(out - ref)))
    assert jnp.allclose(out, ref, atol=2e-2, rtol=2e-2), f"max abs err {max_err}"

    print("KERNEL_OK")
</pallas_src>

<mosaic_0001>
module attributes {stable_mosaic.version = 11 : i64} {
  func.func @discriminator_kernel(%arg0: i32, %arg1: memref<8x784xf32, #tpu.memory_space<vmem>>, %arg2: memref<784x512xbf16, #tpu.memory_space<vmem>>, %arg3: memref<1x512xf32, #tpu.memory_space<vmem>>, %arg4: memref<512x256xbf16, #tpu.memory_space<vmem>>, %arg5: memref<1x256xf32, #tpu.memory_space<vmem>>, %arg6: memref<1x256xf32, #tpu.memory_space<vmem>>, %arg7: memref<1x1xf32, #tpu.memory_space<vmem>>, %arg8: memref<8x1xf32, #tpu.memory_space<vmem>>) attributes {dimension_semantics = [#tpu.dimension_semantics<parallel>], iteration_bounds = array<i64: 1>, scalar_prefetch = 0 : i64, scratch_operands = 0 : i64, tpu.core_type = #tpu.core_type<tc>, window_params = [{transform_indices = @transform_0, window_bounds = array<i64: 8, 784>}, {pipeline_mode = #tpu.pipeline_mode<synchronous>, transform_indices = @transform_1, window_bounds = array<i64: 784, 512>}, {pipeline_mode = #tpu.pipeline_mode<synchronous>, transform_indices = @transform_2, window_bounds = array<i64: 1, 512>}, {pipeline_mode = #tpu.pipeline_mode<synchronous>, transform_indices = @transform_3, window_bounds = array<i64: 512, 256>}, {pipeline_mode = #tpu.pipeline_mode<synchronous>, transform_indices = @transform_4, window_bounds = array<i64: 1, 256>}, {pipeline_mode = #tpu.pipeline_mode<synchronous>, transform_indices = @transform_5, window_bounds = array<i64: 1, 256>}, {pipeline_mode = #tpu.pipeline_mode<synchronous>, transform_indices = @transform_6, window_bounds = array<i64: 1, 1>}, {transform_indices = @transform_7, window_bounds = array<i64: 8, 1>}]} {
    %c0 = arith.constant 0 : index
    %c0_0 = arith.constant 0 : index
    %0 = vector.load %arg1[%c0, %c0_0] : memref<8x784xf32, #tpu.memory_space<vmem>>, vector<8x784xf32>
    %1 = arith.truncf %0 : vector<8x784xf32> to vector<8x784xbf16>
    %c0_1 = arith.constant 0 : index
    %c0_2 = arith.constant 0 : index
    %2 = vector.load %arg2[%c0_1, %c0_2] : memref<784x512xbf16, #tpu.memory_space<vmem>>, vector<784x512xbf16>
    %cst = arith.constant dense<0.000000e+00> : vector<8x512xf32>
    %3 = tpu.matmul %1, %2, %cst {dimension_numbers = #tpu.dot_dimension_numbers<[1], [0], [0], [1], [0, 0, 1, 1], [], []>} : vector<8x784xbf16>, vector<784x512xbf16>, vector<8x512xf32> -> vector<8x512xf32>
    %c0_3 = arith.constant 0 : index
    %c0_4 = arith.constant 0 : index
    %4 = vector.load %arg3[%c0_3, %c0_4] : memref<1x512xf32, #tpu.memory_space<vmem>>, vector<1x512xf32>
    %5 = vector.broadcast %4 : vector<1x512xf32> to vector<8x512xf32>
    %6 = arith.addf %3, %5 : vector<8x512xf32>
    %cst_5 = arith.constant 2.000000e-01 : f32
    %7 = vector.broadcast %cst_5 : f32 to vector<8x512xf32>
    %8 = arith.mulf %7, %6 : vector<8x512xf32>
    %9 = arith.maximumf %6, %8 : vector<8x512xf32>
    %10 = arith.truncf %9 : vector<8x512xf32> to vector<8x512xbf16>
    %c0_6 = arith.constant 0 : index
    %c0_7 = arith.constant 0 : index
    %11 = vector.load %arg4[%c0_6, %c0_7] : memref<512x256xbf16, #tpu.memory_space<vmem>>, vector<512x256xbf16>
    %cst_8 = arith.constant dense<0.000000e+00> : vector<8x256xf32>
    %12 = tpu.matmul %10, %11, %cst_8 {dimension_numbers = #tpu.dot_dimension_numbers<[1], [0], [0], [1], [0, 0, 1, 1], [], []>} : vector<8x512xbf16>, vector<512x256xbf16>, vector<8x256xf32> -> vector<8x256xf32>
    %c0_9 = arith.constant 0 : index
    %c0_10 = arith.constant 0 : index
    %13 = vector.load %arg5[%c0_9, %c0_10] : memref<1x256xf32, #tpu.memory_space<vmem>>, vector<1x256xf32>
    %14 = vector.broadcast %13 : vector<1x256xf32> to vector<8x256xf32>
    %15 = arith.addf %12, %14 : vector<8x256xf32>
    %cst_11 = arith.constant 2.000000e-01 : f32
    %16 = vector.broadcast %cst_11 : f32 to vector<8x256xf32>
    %17 = arith.mulf %16, %15 : vector<8x256xf32>
    %18 = arith.maximumf %15, %17 : vector<8x256xf32>
    %c0_12 = arith.constant 0 : index
    %c0_13 = arith.constant 0 : index
    %19 = vector.load %arg6[%c0_12, %c0_13] : memref<1x256xf32, #tpu.memory_space<vmem>>, vector<1x256xf32>
    %20 = vector.broadcast %19 : vector<1x256xf32> to vector<8x256xf32>
    %21 = arith.mulf %18, %20 : vector<8x256xf32>
    %cst_14 = arith.constant dense<0.000000e+00> : vector<8xf32>
    %22 = vector.multi_reduction <add>, %21, %cst_14 [1] : vector<8x256xf32> to vector<8xf32>
    %23 = vector.shape_cast %22 : vector<8xf32> to vector<8x1xf32>
    %c0_15 = arith.constant 0 : index
    %c0_16 = arith.constant 0 : index
    %24 = vector.load %arg7[%c0_15, %c0_16] : memref<1x1xf32, #tpu.memory_space<vmem>>, vector<1x1xf32>
    %25 = vector.broadcast %24 : vector<1x1xf32> to vector<8x1xf32>
    %26 = arith.addf %23, %25 : vector<8x1xf32>
    %c0_17 = arith.constant 0 : index
    %c0_18 = arith.constant 0 : index
    %27 = vector.load %arg8[%c0_17, %c0_18] : memref<8x1xf32, #tpu.memory_space<vmem>>, vector<8x1xf32>
    tpu.vector_store %arg8[%c0_17, %c0_18], %26 {strides = array<i32>} : memref<8x1xf32, #tpu.memory_space<vmem>>, vector<8x1xf32>,
    return
  }
  func.func @transform_0(%arg0: i32) -> (i32, i32) {
    %c0_i32 = arith.constant 0 : i32
    %c0_i32_0 = arith.constant 0 : i32
    return %arg0, %c0_i32 : i32, i32
  }
  func.func @transform_1(%arg0: i32) -> (i32, i32) {
    %c0_i32 = arith.constant 0 : i32
    %c0_i32_0 = arith.constant 0 : i32
    %c0_i32_1 = arith.constant 0 : i32
    return %c0_i32, %c0_i32_0 : i32, i32
  }
  func.func @transform_2(%arg0: i32) -> (i32, i32) {
    %c0_i32 = arith.constant 0 : i32
    %c0_i32_0 = arith.constant 0 : i32
    %c0_i32_1 = arith.constant 0 : i32
    return %c0_i32, %c0_i32_0 : i32, i32
  }
  func.func @transform_3(%arg0: i32) -> (i32, i32) {
    %c0_i32 = arith.constant 0 : i32
    %c0_i32_0 = arith.constant 0 : i32
    %c0_i32_1 = arith.constant 0 : i32
    return %c0_i32, %c0_i32_0 : i32, i32
  }
  func.func @transform_4(%arg0: i32) -> (i32, i32) {
    %c0_i32 = arith.constant 0 : i32
    %c0_i32_0 = arith.constant 0 : i32
    %c0_i32_1 = arith.constant 0 : i32
    return %c0_i32, %c0_i32_0 : i32, i32
  }
  func.func @transform_5(%arg0: i32) -> (i32, i32) {
    %c0_i32 = arith.constant 0 : i32
    %c0_i32_0 = arith.constant 0 : i32
    %c0_i32_1 = arith.constant 0 : i32
    return %c0_i32, %c0_i32_0 : i32, i32
  }
  func.func @transform_6(%arg0: i32) -> (i32, i32) {
    %c0_i32 = arith.constant 0 : i32
    %c0_i32_0 = arith.constant 0 : i32
    %c0_i32_1 = arith.constant 0 : i32
    return %c0_i32, %c0_i32_0 : i32, i32
  }
  func.func @transform_7(%arg0: i32) -> (i32, i32) {
    %c0_i32 = arith.constant 0 : i32
    %c0_i32_0 = arith.constant 0 : i32
    return %arg0, %c0_i32 : i32, i32
  }
}

</mosaic_0001>

<bundles_post_ra>
// kernel: tpu_custom_call.1
= control target key start
LH: loop header
LB: loop body
LE: loop exit
PB: predicated region body
PF: predicated region fallthrough
CT: control target
= control target key end

     0   :  { %s2978_s0 = inlined_call_operand.hbm [shape: f32[8,784], index: 0, kind: input, shape index: {}]   ;;  %s2979_s1 = inlined_call_operand.hbm [shape: bf16[784,512], index: 1, kind: input, shape index: {}]   ;;  %s2980_s2 = inlined_call_operand.vmem [shape: f32[1,512], index: 2, kind: input, shape index: {}]   ;;  %s2981_s3 = inlined_call_operand.hbm [shape: bf16[512,256], index: 3, kind: input, shape index: {}]   ;;  %s2982_s4 = inlined_call_operand.vmem [shape: f32[1,256], index: 4, kind: input, shape index: {}]   ;;  %s2983_s5 = inlined_call_operand.vmem [shape: f32[1,256], index: 5, kind: input, shape index: {}]   ;;  %s2984_s6 = inlined_call_operand.<no memory space> [shape: f32[1,1], index: 6, kind: input, shape index: {}]   ;;  %s2985_s7 = inlined_call_operand.vmem [shape: f32[8,1], index: 7, kind: output, shape index: {}]  }
   0x1   :  { %v12_v0 = vstv %s2984_s6 }
   0x2   :  { %13 = vst [vmem:[#allocation2] sm:$0x1] %v12_v0 }
   0x3   :  { %14 = vsyncpa [#allocation4], 0 }
   0x4   :  { %15 = vsyncpa [#allocation6], 0  ;;  %s2864_s26 = smov [#allocation5]  }
   0x5   :  { %s31_s27 = sshll.u32 %s2864_s26, 4  ;;  %s32_s27 = int_to_ptr.vmem [resolvable:$true] %s31_s27 }
   0x6   :  { %s2808_s28 = scalar_lea.vmem %s32_s27, 25088  ;;  %p2813_p1 = scmp.lt.s32.totalorder %s32_s27, %s32_s27 }
   0x7   :  { %p2809_p0 = scmp.ne.s32.totalorder %s32_s27, %s2808_s28  ;;  %p2814_p2 = scmp.lt.s32.totalorder %s2808_s28, %s2808_s28 }
   0x9   :  { %p2815_p3 = por %p2814_p2, %p2813_p1 }
   0xb   :  { %p2816_p4 = pnand %p2815_p3, %p2809_p0 }
   0xd   :  { %2819 = shalt.err (!%p2816_p4)
}
   0xe   :  { %s2865_s29 = smov 256   ;;  %s2866_s30 = smov 16  }
   0xf   :  { %37 = dma.hbm_to_vmem [thread:$0]  %s2979_s1, 25088, %s32_s27, [#allocation6], %s2865_s29, %s2865_s29, %s2866_s30  }
  0x10   :  { %s2867_s6 = smov [#allocation3]   ;;  %s2868_s11 = smov [#allocation7]  }
  0x11   :  { %s22_s10 = sshll.u32 %s2867_s6, 4  ;;  %s45_s12 = sshll.u32 %s2868_s11, 4  ;;  %s23_s10 = int_to_ptr.vmem [resolvable:$true] %s22_s10  ;;  %s46_s12 = int_to_ptr.vmem [resolvable:$true] %s45_s12 }
  0x12   :  { %s2828_s13 = scalar_lea.vmem %s23_s10, 896  ;;  %p2833_p6 = scmp.lt.s32.totalorder %s23_s10, %s23_s10 }
  0x13   :  { %p2829_p5 = scmp.ne.s32.totalorder %s23_s10, %s2828_s13  ;;  %p2834_p7 = scmp.lt.s32.totalorder %s2828_s13, %s2828_s13 }
  0x15   :  { %p2835_p8 = por %p2834_p7, %p2833_p6 }
  0x17   :  { %p2836_p9 = pnand %p2835_p8, %p2829_p5 }
  0x19   :  { %2839 = shalt.err (!%p2836_p9)
}
  0x1a   :  { %25 = dma.hbm_to_vmem [thread:$0]  %s2978_s0, 896, %s23_s10, [#allocation4]  }
  0x1b   :  { %s2848_s16 = scalar_lea.vmem %s46_s12, 8192  ;;  %p2853_p11 = scmp.lt.s32.totalorder %s46_s12, %s46_s12 }
  0x1c   :  { %p2849_p10 = scmp.ne.s32.totalorder %s46_s12, %s2848_s16  ;;  %p2854_p12 = scmp.lt.s32.totalorder %s2848_s16, %s2848_s16 }
  0x1e   :  { %p2855_p13 = por %p2854_p12, %p2853_p11 }
  0x20   :  { %p2856_p0 = pnand %p2855_p13, %p2849_p10 }
  0x22   :  { %2859 = shalt.err (!%p2856_p0)
}
  0x23   :  { %s2869_s1 = smov 128   ;;  %s2870_s17 = smov 8  }
  0x24   :  { %51 = dma.hbm_to_vmem [thread:$0]  %s2981_s3, 8192, %s46_s12, [#allocation6], %s2869_s1, %s2869_s1, %s2870_s17  }
  0x25   :  { %2860 = dma.done.wait [#allocation4], 896  }
  0x26   :  { %2861 = vsyncadd [#allocation4], 4294966400 }
  0x27   :  { %2862 = dma.done.wait [#allocation6], 33280  }
  0x28   :  { %2863 = vsyncadd [#allocation6], 4294934016  ;;  %v2410_v1 = vld [vmem:[#allocation5 + $0xe4] ss:$16 sps:$4 sm:$0xff]   ;;  %v2414_v3 = vld [vmem:[#allocation5 + $0xe0] ss:$16 sps:$4 sm:$0xff]  }
  0x29   :  { %v2412_v2 = vld [vmem:[#allocation5 + $0x2e4] ss:$16 sps:$4 sm:$0xff]   ;;  %1284 = vmatprep.subr.bf16.mxu0 %v2410_v1  ;;  %v2415_v4 = vld [vmem:[#allocation5 + $0x2e0] ss:$16 sps:$4 sm:$0xff]   ;;  %vm1280_vm0 = vcmask 130048   ;;  %vm2131_vm1 = vcmask 7168  }
  0x2a   :  { %1325 = vmatprep.subr.bf16.mxu1 %v2412_v2  ;;  %v2416_v5 = vld [vmem:[#allocation5 + $0xc4] ss:$16 sps:$4 sm:$0xff]   ;;  %1285 = vmatpush1.bf16.msra.mxu0 %v2414_v3  ;;  %v2420_v7 = vld [vmem:[#allocation5 + $0xc0] ss:$16 sps:$4 sm:$0xff]  }
  0x2b   :  { %1326 = vmatpush1.bf16.msra.mxu1 %v2415_v4  ;;  %v2418_v6 = vld [vmem:[#allocation5 + $0x2c4] ss:$16 sps:$4 sm:$0xff]   ;;  %1286 = vmatprep.subr.bf16.mxu0 %v2416_v5  ;;  %v2421_v8 = vld [vmem:[#allocation5 + $0x2c0] ss:$16 sps:$4 sm:$0xff]   ;;  %v68_v5 = vld [vmem:[#allocation3] sm:$0xff] }
  0x2c   :  { %1327 = vmatprep.subr.bf16.mxu1 %v2418_v6  ;;  %v2422_v9 = vld [vmem:[#allocation5 + $0xa4] ss:$16 sps:$4 sm:$0xff]   ;;  %v2426_v11 = vld [vmem:[#allocation5 + $0xa0] ss:$16 sps:$4 sm:$0xff]   ;;  %v70_v6 = vld [vmem:[#allocation3 + $0x10] sm:$0xff] }
  0x2d   :  { %v2424_v10 = vld [vmem:[#allocation5 + $0x2a4] ss:$16 sps:$4 sm:$0xff]   ;;  %v2427_v12 = vld [vmem:[#allocation5 + $0x2a0] ss:$16 sps:$4 sm:$0xff]  }
  0x2e   :  { %1287 = vmatpush1.bf16.msra.mxu0 %v2420_v7  ;;  %v2428_v13 = vld [vmem:[#allocation5 + $0x84] ss:$16 sps:$4 sm:$0xff]   ;;  %v2432_v15 = vld [vmem:[#allocation5 + $0x80] ss:$16 sps:$4 sm:$0xff]  }
  0x2f   :  { %1328 = vmatpush1.bf16.msra.mxu1 %v2421_v8  ;;  %1288 = vmatprep.subr.bf16.mxu0 %v2422_v9  ;;  %v2430_v14 = vld [vmem:[#allocation5 + $0x284] ss:$16 sps:$4 sm:$0xff]   ;;  %v2433_v16 = vld [vmem:[#allocation5 + $0x280] ss:$16 sps:$4 sm:$0xff]   ;;  %v2930_v9 = vpack.c.bf16 %v68_v5, %v68_v5  ;;  %v2589_v5 = vld [vmem:[#allocation5 + $0x16c] ss:$16 sps:$4 sm:$0xff]  }
  0x30   :  { %1329 = vmatprep.subr.bf16.mxu1 %v2424_v10  ;;  %v2434_v17 = vld [vmem:[#allocation5 + $0x64] ss:$16 sps:$4 sm:$0xff]   ;;  %v2438_v19 = vld [vmem:[#allocation5 + $0x60] ss:$16 sps:$4 sm:$0xff]   ;;  %v2932_v10 = vpack.c.bf16 %v70_v6, %v70_v6 }
  0x31   :  { %v2436_v18 = vld [vmem:[#allocation5 + $0x264] ss:$16 sps:$4 sm:$0xff]   ;;  %v2439_v20 = vld [vmem:[#allocation5 + $0x260] ss:$16 sps:$4 sm:$0xff]  }
  0x32   :  { %1289 = vmatpush1.bf16.msra.mxu0 %v2426_v11  ;;  %v2440_v21 = vld [vmem:[#allocation5 + $0x44] ss:$16 sps:$4 sm:$0xff]   ;;  %v2444_v23 = vld [vmem:[#allocation5 + $0x40] ss:$16 sps:$4 sm:$0xff]  }
  0x33   :  { %1330 = vmatpush1.bf16.msra.mxu1 %v2427_v12  ;;  %1290 = vmatprep.subr.bf16.mxu0 %v2428_v13  ;;  %v2442_v22 = vld [vmem:[#allocation5 + $0x244] ss:$16 sps:$4 sm:$0xff]   ;;  %v2445_v24 = vld [vmem:[#allocation5 + $0x240] ss:$16 sps:$4 sm:$0xff]  }
  0x34   :  { %1331 = vmatprep.subr.bf16.mxu1 %v2430_v14  ;;  %v2446_v25 = vld [vmem:[#allocation5 + $0x24] ss:$16 sps:$4 sm:$0xff]   ;;  %v2450_v27 = vld [vmem:[#allocation5 + $0x20] ss:$16 sps:$4 sm:$0xff]   ;;  %v2517_v14 = vld [vmem:[#allocation5 + $0xec] ss:$16 sps:$4 sm:$0xff]  }
  0x35   :  { %v2448_v26 = vld [vmem:[#allocation5 + $0x224] ss:$16 sps:$4 sm:$0xff]   ;;  %v2451_v28 = vld [vmem:[#allocation5 + $0x220] ss:$16 sps:$4 sm:$0xff]  }
  0x36   :  { %1291 = vmatpush1.bf16.msra.mxu0 %v2432_v15  ;;  %v2452_v29 = vld [vmem:[#allocation5 + $0x4] ss:$16 sps:$4 sm:$0xff]   ;;  %v2456_v31 = vld [vmem:[#allocation5] ss:$16 sps:$4 sm:$0xff]  }
  0x37   :  { %1332 = vmatpush1.bf16.msra.mxu1 %v2433_v16  ;;  %1292 = vmatprep.subr.bf16.mxu0 %v2434_v17  ;;  %v2454_v30 = vld [vmem:[#allocation5 + $0x204] ss:$16 sps:$4 sm:$0xff]   ;;  %v2457_v32 = vld [vmem:[#allocation5 + $0x200] ss:$16 sps:$4 sm:$0xff]   ;;  %v74_v16 = vld [vmem:[#allocation3 + $0x30] sm:$0xff]  ;;  %v2871_v17 = vmov 0  }
  0x38   :  { %1333 = vmatprep.subr.bf16.mxu1 %v2436_v18  ;;  %v2458_v33 = vld [vmem:[#allocation5 + $0x1e4] ss:$16 sps:$4 sm:$0xff]   ;;  %v2462_v35 = vld [vmem:[#allocation5 + $0x1e0] ss:$16 sps:$4 sm:$0xff]  }
  0x39   :  { %v2460_v34 = vld [vmem:[#allocation5 + $0x3e4] ss:$16 sps:$4 sm:$0xff]   ;;  %v2463_v36 = vld [vmem:[#allocation5 + $0x3e0] ss:$16 sps:$4 sm:$0xff]  }
  0x3a   :  { %1293 = vmatpush1.bf16.msra.mxu0 %v2438_v19  ;;  %v2464_v37 = vld [vmem:[#allocation5 + $0x1c4] ss:$16 sps:$4 sm:$0xff]   ;;  %v2468_v39 = vld [vmem:[#allocation5 + $0x1c0] ss:$16 sps:$4 sm:$0xff]   ;;  %v2515_v19 = vld [vmem:[#allocation5 + $0xe8] ss:$16 sps:$4 sm:$0xff]  }
  0x3b   :  { %1334 = vmatpush1.bf16.msra.mxu1 %v2439_v20  ;;  %1294 = vmatprep.subr.bf16.mxu0 %v2440_v21  ;;  %v2466_v38 = vld [vmem:[#allocation5 + $0x3c4] ss:$16 sps:$4 sm:$0xff]   ;;  %v2469_v40 = vld [vmem:[#allocation5 + $0x3c0] ss:$16 sps:$4 sm:$0xff]   ;;  %v2937_v20 = vpack.c.bf16 %v74_v16, %v74_v16  ;;  %v72_v16 = vld [vmem:[#allocation3 + $0x20] sm:$0xff] }
  0x3c   :  { %1335 = vmatprep.subr.bf16.mxu1 %v2442_v22  ;;  %v2470_v41 = vld [vmem:[#allocation5 + $0x1a4] ss:$16 sps:$4 sm:$0xff]   ;;  %v2474_v43 = vld [vmem:[#allocation5 + $0x1a0] ss:$16 sps:$4 sm:$0xff]   ;;  %v2523_v22 = vld [vmem:[#allocation5 + $0xcc] ss:$16 sps:$4 sm:$0xff]  }
  0x3d   :  { %v2472_v42 = vld [vmem:[#allocation5 + $0x3a4] ss:$16 sps:$4 sm:$0xff]   ;;  %v2475_v44 = vld [vmem:[#allocation5 + $0x3a0] ss:$16 sps:$4 sm:$0xff]  }
  0x3e   :  { %1295 = vmatpush1.bf16.msra.mxu0 %v2444_v23  ;;  %v2476_v45 = vld [vmem:[#allocation5 + $0x184] ss:$16 sps:$4 sm:$0xff]   ;;  %v2480_v48 = vld [vmem:[#allocation5 + $0x180] ss:$16 sps:$4 sm:$0xff]  }
  0x3f   :  { %1336 = vmatpush1.bf16.msra.mxu1 %v2445_v24  ;;  %1296 = vmatprep.subr.bf16.mxu0 %v2446_v25  ;;  %v2478_v46 = vld [vmem:[#allocation5 + $0x384] ss:$16 sps:$4 sm:$0xff]   ;;  %v2481_v49 = vld [vmem:[#allocation5 + $0x380] ss:$16 sps:$4 sm:$0xff]   ;;  %v2521_v24 = vld [vmem:[#allocation5 + $0xc8] ss:$16 sps:$4 sm:$0xff]  }
  0x40   :  { %1337 = vmatprep.subr.bf16.mxu1 %v2448_v26  ;;  %v69_v47 = vld [vmem:[#allocation3 + $0x8] sm:$0xff]  ;;  %v71_v51 = vld [vmem:[#allocation3 + $0x18] sm:$0xff]  ;;  %v2529_v26 = vld [vmem:[#allocation5 + $0xac] ss:$16 sps:$4 sm:$0xff]  }
  0x41   :  { %v2924_v50 = vpack.c.bf16 %v69_v47, %v69_v47  ;;  %v2482_v52 = vld [vmem:[#allocation5 + $0x164] ss:$16 sps:$4 sm:$0xff]   ;;  %v2926_v53 = vpack.c.bf16 %v71_v51, %v71_v51  ;;  %v2486_v55 = vld [vmem:[#allocation5 + $0x160] ss:$16 sps:$4 sm:$0xff]  }
  0x42   :  { %1297 = vmatpush1.bf16.msra.mxu0 %v2450_v27  ;;  %v2484_v54 = vld [vmem:[#allocation5 + $0x364] ss:$16 sps:$4 sm:$0xff]   ;;  %v2487_v56 = vld [vmem:[#allocation5 + $0x360] ss:$16 sps:$4 sm:$0xff]  }
  0x43   :  { %1338 = vmatpush1.bf16.msra.mxu1 %v2451_v28  ;;  %1298 = vmatprep.subr.bf16.mxu0 %v2452_v29  ;;  %v2488_v57 = vld [vmem:[#allocation5 + $0x144] ss:$16 sps:$4 sm:$0xff]   ;;  %v2492_v59 = vld [vmem:[#allocation5 + $0x140] ss:$16 sps:$4 sm:$0xff]   ;;  %v2527_v28 = vld [vmem:[#allocation5 + $0xa8] ss:$16 sps:$4 sm:$0xff]  }
  0x44   :  { %1339 = vmatprep.subr.bf16.mxu1 %v2454_v30  ;;  %1316 = vmatprep.mubr.bf16.mxu0 %v2924_v50  ;;  %v2490_v58 = vld [vmem:[#allocation5 + $0x344] ss:$16 sps:$4 sm:$0xff]   ;;  %v2493_v60 = vld [vmem:[#allocation5 + $0x340] ss:$16 sps:$4 sm:$0xff]   ;;  %v2535_v30 = vld [vmem:[#allocation5 + $0x8c] ss:$16 sps:$4 sm:$0xff]  }
  0x45   :  { %1357 = vmatprep.mubr.bf16.mxu1 %v2926_v53  ;;  %v2494_v61 = vld [vmem:[#allocation5 + $0x124] ss:$16 sps:$4 sm:$0xff]   ;;  %v2498_v63 = vld [vmem:[#allocation5 + $0x120] ss:$16 sps:$4 sm:$0xff]  }
  0x46   :  { %1299 = vmatpush1.bf16.msra.mxu0 %v2456_v31  ;;  %v2496_v62 = vld [vmem:[#allocation5 + $0x324] ss:$16 sps:$4 sm:$0xff]   ;;  %v2499_v0 = vld [vmem:[#allocation5 + $0x320] ss:$16 sps:$4 sm:$0xff]  }
  0x47   :  { %1340 = vmatpush1.bf16.msra.mxu1 %v2457_v32  ;;  %1300 = vmatprep.subr.bf16.mxu0 %v2458_v33  ;;  %v2500_v1 = vld [vmem:[#allocation5 + $0x104] ss:$16 sps:$4 sm:$0xff]   ;;  %v2504_v3 = vld [vmem:[#allocation5 + $0x100] ss:$16 sps:$4 sm:$0xff]   ;;  %v2533_v32 = vld [vmem:[#allocation5 + $0x88] ss:$16 sps:$4 sm:$0xff]  }
  0x48   :  { %1341 = vmatprep.subr.bf16.mxu1 %v2460_v34  ;;  %v2502_v2 = vld [vmem:[#allocation5 + $0x304] ss:$16 sps:$4 sm:$0xff]   ;;  %v2505_v4 = vld [vmem:[#allocation5 + $0x300] ss:$16 sps:$4 sm:$0xff]   ;;  %v2541_v34 = vld [vmem:[#allocation5 + $0x6c] ss:$16 sps:$4 sm:$0xff]  }
  0x49   :  { %v2508_v7 = vld [vmem:[#allocation5 + $0x4e4] ss:$16 sps:$4 sm:$0xff]   ;;  %v2506_v11 = vld [vmem:[#allocation5 + $0x4e0] ss:$16 sps:$4 sm:$0xff]  }
  0x4a   :  { %1301 = vmatpush2.bf16.msra.mxu0 %v2462_v35  ;;  %v2511_v8 = vld [vmem:[#allocation5 + $0x604] ss:$16 sps:$4 sm:$0xff]   ;;  %v2509_v12 = vld [vmem:[#allocation5 + $0x600] ss:$16 sps:$4 sm:$0xff]  }
  0x4b   :  { %1342 = vmatpush2.bf16.msra.mxu1 %v2463_v36  ;;  %1302 = vmatprep.subr.bf16.mxu0 %v2464_v37  ;;  %v2514_v13 = vld [vmem:[#allocation5 + $0x4c4] ss:$16 sps:$4 sm:$0xff]   ;;  %v2512_v15 = vld [vmem:[#allocation5 + $0x4c0] ss:$16 sps:$4 sm:$0xff]  }
  0x4c   :  { %1343 = vmatprep.subr.bf16.mxu1 %v2466_v38  ;;  %v2520_v18 = vld [vmem:[#allocation5 + $0x4a4] ss:$16 sps:$4 sm:$0xff]   ;;  %v2518_v21 = vld [vmem:[#allocation5 + $0x4a0] ss:$16 sps:$4 sm:$0xff]   ;;  %v2539_v38 = vld [vmem:[#allocation5 + $0x68] ss:$16 sps:$4 sm:$0xff]  }
  0x4d   :  { %v2526_v23 = vld [vmem:[#allocation5 + $0x484] ss:$16 sps:$4 sm:$0xff]   ;;  %v2524_v25 = vld [vmem:[#allocation5 + $0x480] ss:$16 sps:$4 sm:$0xff]  }
  0x4e   :  { %1303 = vmatpush2.bf16.msra.mxu0 %v2468_v39  ;;  %v2532_v27 = vld [vmem:[#allocation5 + $0x464] ss:$16 sps:$4 sm:$0xff]   ;;  %v2530_v29 = vld [vmem:[#allocation5 + $0x460] ss:$16 sps:$4 sm:$0xff]  }
  0x4f   :  { %1344 = vmatpush2.bf16.msra.mxu1 %v2469_v40  ;;  %1304 = vmatprep.subr.bf16.mxu0 %v2470_v41  ;;  %v2538_v31 = vld [vmem:[#allocation5 + $0x444] ss:$16 sps:$4 sm:$0xff]   ;;  %v2536_v33 = vld [vmem:[#allocation5 + $0x440] ss:$16 sps:$4 sm:$0xff]   ;;  %v2547_v40 = vld [vmem:[#allocation5 + $0x4c] ss:$16 sps:$4 sm:$0xff]  }
  0x50   :  { %1345 = vmatprep.subr.bf16.mxu1 %v2472_v42  ;;  %v2544_v35 = vld [vmem:[#allocation5 + $0x424] ss:$16 sps:$4 sm:$0xff]   ;;  %v2542_v39 = vld [vmem:[#allocation5 + $0x420] ss:$16 sps:$4 sm:$0xff]   ;;  %v2545_v42 = vld [vmem:[#allocation5 + $0x48] ss:$16 sps:$4 sm:$0xff]  }
  0x51   :  { %v73_v36 = vld [vmem:[#allocation3 + $0x28] sm:$0xff] }
  0x52   :  { %1305 = vmatpush2.bf16.msra.mxu0 %v2474_v43  ;;  %v2942_v37 = vpack.c.bf16 %v73_v36, %v73_v36  ;;  %v2550_v41 = vld [vmem:[#allocation5 + $0x404] ss:$16 sps:$4 sm:$0xff]   ;;  %v2548_v43 = vld [vmem:[#allocation5 + $0x400] ss:$16 sps:$4 sm:$0xff]   ;;  %v2628_v36 = vld [vmem:[#allocation5 + $0x26c] ss:$16 sps:$4 sm:$0xff]  }
  0x53   :  { %1346 = vmatpush2.bf16.msra.mxu1 %v2475_v44  ;;  %1306 = vmatprep.subr.bf16.mxu0 %v2476_v45  ;;  %v2553_v44 = vld [vmem:[#allocation5 + $0x2c] ss:$16 sps:$4 sm:$0xff]   ;;  %v2556_v45 = vld [vmem:[#allocation5 + $0x5e4] ss:$16 sps:$4 sm:$0xff]   ;;  %v2554_v47 = vld [vmem:[#allocation5 + $0x5e0] ss:$16 sps:$4 sm:$0xff]  }
  0x54   :  { %1347 = vmatprep.subr.bf16.mxu1 %v2478_v46  ;;  %v2551_v46 = vld [vmem:[#allocation5 + $0x28] ss:$16 sps:$4 sm:$0xff]   ;;  %v2560_v51 = vld [vmem:[#allocation5 + $0x5c0] ss:$16 sps:$4 sm:$0xff]   ;;  %v2592_v6 = vld [vmem:[#allocation5 + $0x524] ss:$16 sps:$4 sm:$0xff]  }
  0x56   :  { %1307 = vmatpush2.bf16.msra.mxu0 %v2480_v48  ;;  %v2559_v48 = vld [vmem:[#allocation5 + $0xc] ss:$16 sps:$4 sm:$0xff]  }
  0x57   :  { %1348 = vmatpush2.bf16.msra.mxu1 %v2481_v49  ;;  %1308 = vmatprep.subr.bf16.mxu0 %v2482_v52  ;;  %v2562_v49 = vld [vmem:[#allocation5 + $0x5c4] ss:$16 sps:$4 sm:$0xff]   ;;  %v2565_v52 = vld [vmem:[#allocation5 + $0x1ec] ss:$16 sps:$4 sm:$0xff]  }
  0x58   :  { %1349 = vmatprep.subr.bf16.mxu1 %v2484_v54  ;;  %v2568_v54 = vld [vmem:[#allocation5 + $0x5a4] ss:$16 sps:$4 sm:$0xff]  }
  0x5a   :  { %1309 = vmatpush2.bf16.msra.mxu0 %v2486_v55  ;;  %v2563_v55 = vld [vmem:[#allocation5 + $0x1e8] ss:$16 sps:$4 sm:$0xff]  }
  0x5b   :  { %1350 = vmatpush2.bf16.msra.mxu1 %v2487_v56  ;;  %1310 = vmatprep.subr.bf16.mxu0 %v2488_v57  ;;  %v2566_v56 = vld [vmem:[#allocation5 + $0x5a0] ss:$16 sps:$4 sm:$0xff]   ;;  %v2571_v57 = vld [vmem:[#allocation5 + $0x1cc] ss:$16 sps:$4 sm:$0xff]  }
  0x5c   :  { %1351 = vmatprep.subr.bf16.mxu1 %v2490_v58  ;;  %v2574_v58 = vld [vmem:[#allocation5 + $0x584] ss:$16 sps:$4 sm:$0xff]  }
  0x5e   :  { %1311 = vmatpush2.bf16.msra.mxu0 %v2492_v59  ;;  %v2569_v59 = vld [vmem:[#allocation5 + $0x1c8] ss:$16 sps:$4 sm:$0xff]  }
  0x5f   :  { %1352 = vmatpush2.bf16.msra.mxu1 %v2493_v60  ;;  %1312 = vmatprep.subr.bf16.mxu0 %v2494_v61  ;;  %v2572_v60 = vld [vmem:[#allocation5 + $0x580] ss:$16 sps:$4 sm:$0xff]   ;;  %v2577_v61 = vld [vmem:[#allocation5 + $0x1ac] ss:$16 sps:$4 sm:$0xff]  }
  0x60   :  { %1353 = vmatprep.subr.bf16.mxu1 %v2496_v62  ;;  %v2580_v62 = vld [vmem:[#allocation5 + $0x564] ss:$16 sps:$4 sm:$0xff]  }
  0x62   :  { %1313 = vmatpush2.bf16.msra.mxu0 %v2498_v63  ;;  %v2575_v63 = vld [vmem:[#allocation5 + $0x1a8] ss:$16 sps:$4 sm:$0xff]  }
  0x63   :  { %1354 = vmatpush2.bf16.msra.mxu1 %v2499_v0  ;;  %1314 = vmatprep.subr.bf16.mxu0 %v2500_v1  ;;  %v2578_v0 = vld [vmem:[#allocation5 + $0x560] ss:$16 sps:$4 sm:$0xff]   ;;  %v2583_v1 = vld [vmem:[#allocation5 + $0x18c] ss:$16 sps:$4 sm:$0xff]  }
  0x64   :  { %1355 = vmatprep.subr.bf16.mxu1 %v2502_v2  ;;  %v2586_v2 = vld [vmem:[#allocation5 + $0x544] ss:$16 sps:$4 sm:$0xff]  }
  0x66   :  { %1315 = vmatpush2.bf16.msra.mxu0 %v2504_v3  ;;  %v2581_v3 = vld [vmem:[#allocation5 + $0x188] ss:$16 sps:$4 sm:$0xff]  }
  0x67   :  { %1356 = vmatpush2.bf16.msra.mxu1 %v2505_v4  ;;  %1366 = vmatprep.subr.bf16.mxu0 %v2508_v7  ;;  %v2584_v4 = vld [vmem:[#allocation5 + $0x540] ss:$16 sps:$4 sm:$0xff]   ;;  %v2587_v7 = vld [vmem:[#allocation5 + $0x168] ss:$16 sps:$4 sm:$0xff]  }
  0x68   :  { %1421 = vmatprep.subr.bf16.mxu1 %v2511_v8  ;;  %v2590_v8 = vld [vmem:[#allocation5 + $0x520] ss:$16 sps:$4 sm:$0xff]  }
  0x69   :  { %1317 = vmatmul.mubr.bf16.vlgmr.msra.gmra.mxu0 %v2930_v9 }
  0x6a   :  { %1358 = vmatmul.mubr.bf16.vlgmr.msra.gmra.mxu1 %v2932_v10  ;;  %1367 = vmatpush1.bf16.msra.mxu0 %v2506_v11  ;;  %v2595_v11 = vld [vmem:[#allocation5 + $0x14c] ss:$16 sps:$4 sm:$0xff]  }
  0x6b   :  { %1422 = vmatpush1.bf16.msra.mxu1 %v2509_v12  ;;  %1368 = vmatprep.subr.bf16.mxu0 %v2514_v13  ;;  %v2598_v12 = vld [vmem:[#allocation5 + $0x504] ss:$16 sps:$4 sm:$0xff]   ;;  %v2593_v13 = vld [vmem:[#allocation5 + $0x148] ss:$16 sps:$4 sm:$0xff]  }
  0x6c   :  { %1439 = vmatprep.mubr.bf16.mxu1 %v2871_v17  ;;  %1448 = vmatprep.subr.bf16.mxu1 %v2517_v14  ;;  %v2596_v14 = vld [vmem:[#allocation5 + $0x500] ss:$16 sps:$4 sm:$0xff]  }
  0x6d   :  { %1398 = vmatprep.mubr.bf16.mxu0 %v2942_v37 }
  0x6e   :  { %1369 = vmatpush1.bf16.msra.mxu0 %v2512_v15  ;;  %v2601_v15 = vld [vmem:[#allocation5 + $0x12c] ss:$16 sps:$4 sm:$0xff]  }
  0x6f   :  { %1370 = vmatprep.subr.bf16.mxu0 %v2520_v18  ;;  %v2604_v18 = vld [vmem:[#allocation5 + $0x2ec] ss:$16 sps:$4 sm:$0xff]  }
  0x72   :  { %2335 = vmatmul.mubr.msk.bf16.vlgmr.msra.gmra.mxu1 %vm1280_vm0, %v2937_v20  ;;  %1371 = vmatpush1.bf16.msra.mxu0 %v2518_v21  ;;  %v2945_v21 = vpack.c.bf16 %v72_v16, %v72_v16  ;;  %v2691_v16 = vld [vmem:[#allocation5 + $0x54c] ss:$16 sps:$4 sm:$0xff]  }
  0x73   :  { %1449 = vmatpush1.bf16.msra.mxu1 %v2515_v19  ;;  %1372 = vmatprep.subr.bf16.mxu0 %v2526_v23  ;;  %v2599_v19 = vld [vmem:[#allocation5 + $0x128] ss:$16 sps:$4 sm:$0xff]   ;;  %v2607_v23 = vld [vmem:[#allocation5 + $0x10c] ss:$16 sps:$4 sm:$0xff]  }
  0x74   :  { %1450 = vmatprep.subr.bf16.mxu1 %v2523_v22  ;;  %1480 = vmatprep.mubr.bf16.mxu1 %v2924_v50  ;;  %v2557_v50 = vld [vmem:[#allocation5 + $0x8] ss:$16 sps:$4 sm:$0xff]  }
  0x75   :  { %v2602_v22 = vld [vmem:[#allocation5 + $0x2e8] ss:$16 sps:$4 sm:$0xff]  }
  0x76   :  { %1373 = vmatpush1.bf16.msra.mxu0 %v2524_v25  ;;  %v2605_v25 = vld [vmem:[#allocation5 + $0x108] ss:$16 sps:$4 sm:$0xff]  }
  0x77   :  { %1451 = vmatpush1.bf16.msra.mxu1 %v2521_v24  ;;  %1374 = vmatprep.subr.bf16.mxu0 %v2532_v27  ;;  %v2610_v24 = vld [vmem:[#allocation5 + $0x2cc] ss:$16 sps:$4 sm:$0xff]  }
  0x78   :  { %1452 = vmatprep.subr.bf16.mxu1 %v2529_v26  ;;  %v2608_v26 = vld [vmem:[#allocation5 + $0x2c8] ss:$16 sps:$4 sm:$0xff]   ;;  %v2613_v27 = vld [vmem:[#allocation5 + $0x4ec] ss:$16 sps:$4 sm:$0xff]  }
  0x7a   :  { %1375 = vmatpush1.bf16.msra.mxu0 %v2530_v29  ;;  %v2611_v29 = vld [vmem:[#allocation5 + $0x4e8] ss:$16 sps:$4 sm:$0xff]  }
  0x7b   :  { %1453 = vmatpush1.bf16.msra.mxu1 %v2527_v28  ;;  %1376 = vmatprep.subr.bf16.mxu0 %v2538_v31  ;;  %v2616_v28 = vld [vmem:[#allocation5 + $0x2ac] ss:$16 sps:$4 sm:$0xff]  }
  0x7c   :  { %1454 = vmatprep.subr.bf16.mxu1 %v2535_v30  ;;  %v2614_v30 = vld [vmem:[#allocation5 + $0x2a8] ss:$16 sps:$4 sm:$0xff]   ;;  %v2619_v31 = vld [vmem:[#allocation5 + $0x4cc] ss:$16 sps:$4 sm:$0xff]  }
  0x7e   :  { %1377 = vmatpush1.bf16.msra.mxu0 %v2536_v33  ;;  %v2617_v33 = vld [vmem:[#allocation5 + $0x4c8] ss:$16 sps:$4 sm:$0xff]  }
  0x7f   :  { %1455 = vmatpush1.bf16.msra.mxu1 %v2533_v32  ;;  %1378 = vmatprep.subr.bf16.mxu0 %v2544_v35  ;;  %v2622_v32 = vld [vmem:[#allocation5 + $0x28c] ss:$16 sps:$4 sm:$0xff]  }
  0x80   :  { %1456 = vmatprep.subr.bf16.mxu1 %v2541_v34  ;;  %v2620_v34 = vld [vmem:[#allocation5 + $0x288] ss:$16 sps:$4 sm:$0xff]   ;;  %v2625_v35 = vld [vmem:[#allocation5 + $0x4ac] ss:$16 sps:$4 sm:$0xff]  }
  0x82   :  { %1379 = vmatpush1.bf16.msra.mxu0 %v2542_v39  ;;  %v2631_v39 = vld [vmem:[#allocation5 + $0x48c] ss:$16 sps:$4 sm:$0xff]  }
  0x83   :  { %1457 = vmatpush1.bf16.msra.mxu1 %v2539_v38  ;;  %1380 = vmatprep.subr.bf16.mxu0 %v2550_v41  ;;  %v2623_v38 = vld [vmem:[#allocation5 + $0x4a8] ss:$16 sps:$4 sm:$0xff]  }
  0x84   :  { %1458 = vmatprep.subr.bf16.mxu1 %v2547_v40  ;;  %v2634_v40 = vld [vmem:[#allocation5 + $0x24c] ss:$16 sps:$4 sm:$0xff]   ;;  %v2629_v41 = vld [vmem:[#allocation5 + $0x488] ss:$16 sps:$4 sm:$0xff]  }
  0x86   :  { %1381 = vmatpush1.bf16.msra.mxu0 %v2548_v43  ;;  %v2640_v43 = vld [vmem:[#allocation5 + $0x22c] ss:$16 sps:$4 sm:$0xff]  }
  0x87   :  { %1459 = vmatpush1.bf16.msra.mxu1 %v2545_v42  ;;  %1382 = vmatprep.subr.bf16.mxu0 %v2556_v45  ;;  %v2637_v42 = vld [vmem:[#allocation5 + $0x46c] ss:$16 sps:$4 sm:$0xff]   ;;  %v2638_v45 = vld [vmem:[#allocation5 + $0x228] ss:$16 sps:$4 sm:$0xff]  }
  0x88   :  { %1460 = vmatprep.subr.bf16.mxu1 %v2553_v44  ;;  %v2635_v44 = vld [vmem:[#allocation5 + $0x468] ss:$16 sps:$4 sm:$0xff]  }
  0x8a   :  { %1383 = vmatpush2.bf16.msra.mxu0 %v2554_v47  ;;  %v2641_v47 = vld [vmem:[#allocation5 + $0x448] ss:$16 sps:$4 sm:$0xff]  }
  0x8b   :  { %1461 = vmatpush1.bf16.msra.mxu1 %v2551_v46  ;;  %1384 = vmatprep.subr.bf16.mxu0 %v2562_v49  ;;  %v2646_v46 = vld [vmem:[#allocation5 + $0x20c] ss:$16 sps:$4 sm:$0xff]  }
  0x8c   :  { %1462 = vmatprep.subr.bf16.mxu1 %v2559_v48  ;;  %v2644_v48 = vld [vmem:[#allocation5 + $0x208] ss:$16 sps:$4 sm:$0xff]   ;;  %v2649_v49 = vld [vmem:[#allocation5 + $0x42c] ss:$16 sps:$4 sm:$0xff]  }
  0x8e   :  { %1385 = vmatpush2.bf16.msra.mxu0 %v2560_v51  ;;  %v2647_v51 = vld [vmem:[#allocation5 + $0x428] ss:$16 sps:$4 sm:$0xff]  }
  0x8f   :  { %1463 = vmatpush1.bf16.msra.mxu1 %v2557_v50  ;;  %1386 = vmatprep.subr.bf16.mxu0 %v2568_v54  ;;  %v2652_v50 = vld [vmem:[#allocation5 + $0x3ec] ss:$16 sps:$4 sm:$0xff]  }
  0x90   :  { %1464 = vmatprep.subr.bf16.mxu1 %v2565_v52  ;;  %v2650_v52 = vld [vmem:[#allocation5 + $0x3e8] ss:$16 sps:$4 sm:$0xff]   ;;  %v2655_v54 = vld [vmem:[#allocation5 + $0x40c] ss:$16 sps:$4 sm:$0xff]  }
  0x92   :  { %1387 = vmatpush2.bf16.msra.mxu0 %v2566_v56  ;;  %v2653_v56 = vld [vmem:[#allocation5 + $0x408] ss:$16 sps:$4 sm:$0xff]  }
  0x93   :  { %1465 = vmatpush2.bf16.msra.mxu1 %v2563_v55  ;;  %1388 = vmatprep.subr.bf16.mxu0 %v2574_v58  ;;  %v2658_v55 = vld [vmem:[#allocation5 + $0x3cc] ss:$16 sps:$4 sm:$0xff]  }
  0x94   :  { %1466 = vmatprep.subr.bf16.mxu1 %v2571_v57  ;;  %v2656_v57 = vld [vmem:[#allocation5 + $0x3c8] ss:$16 sps:$4 sm:$0xff]   ;;  %v2661_v58 = vld [vmem:[#allocation5 + $0x5ec] ss:$16 sps:$4 sm:$0xff]  }
  0x96   :  { %1389 = vmatpush2.bf16.msra.mxu0 %v2572_v60  ;;  %v2659_v60 = vld [vmem:[#allocation5 + $0x5e8] ss:$16 sps:$4 sm:$0xff]  }
  0x97   :  { %1467 = vmatpush2.bf16.msra.mxu1 %v2569_v59  ;;  %1390 = vmatprep.subr.bf16.mxu0 %v2580_v62  ;;  %v2664_v59 = vld [vmem:[#allocation5 + $0x3ac] ss:$16 sps:$4 sm:$0xff]  }
  0x98   :  { %1468 = vmatprep.subr.bf16.mxu1 %v2577_v61  ;;  %v2662_v61 = vld [vmem:[#allocation5 + $0x3a8] ss:$16 sps:$4 sm:$0xff]   ;;  %v2667_v62 = vld [vmem:[#allocation5 + $0x5cc] ss:$16 sps:$4 sm:$0xff]  }
  0x9a   :  { %1391 = vmatpush2.bf16.msra.mxu0 %v2578_v0  ;;  %v2665_v0 = vld [vmem:[#allocation5 + $0x5c8] ss:$16 sps:$4 sm:$0xff]  }
  0x9b   :  { %1469 = vmatpush2.bf16.msra.mxu1 %v2575_v63  ;;  %1392 = vmatprep.subr.bf16.mxu0 %v2586_v2  ;;  %v2670_v63 = vld [vmem:[#allocation5 + $0x38c] ss:$16 sps:$4 sm:$0xff]  }
  0x9c   :  { %1470 = vmatprep.subr.bf16.mxu1 %v2583_v1  ;;  %v2668_v1 = vld [vmem:[#allocation5 + $0x388] ss:$16 sps:$4 sm:$0xff]   ;;  %v2673_v2 = vld [vmem:[#allocation5 + $0x5ac] ss:$16 sps:$4 sm:$0xff]  }
  0x9e   :  { %1393 = vmatpush2.bf16.msra.mxu0 %v2584_v4  ;;  %v2671_v4 = vld [vmem:[#allocation5 + $0x5a8] ss:$16 sps:$4 sm:$0xff]  }
  0x9f   :  { %1471 = vmatpush2.bf16.msra.mxu1 %v2581_v3  ;;  %1394 = vmatprep.subr.bf16.mxu0 %v2592_v6  ;;  %v2676_v3 = vld [vmem:[#allocation5 + $0x36c] ss:$16 sps:$4 sm:$0xff]  }
  0xa0   :  { %1472 = vmatprep.subr.bf16.mxu1 %v2589_v5  ;;  %v2674_v5 = vld [vmem:[#allocation5 + $0x368] ss:$16 sps:$4 sm:$0xff]   ;;  %v2679_v6 = vld [vmem:[#allocation5 + $0x58c] ss:$16 sps:$4 sm:$0xff]  }
  0xa2   :  { %1395 = vmatpush2.bf16.msra.mxu0 %v2590_v8  ;;  %v2677_v8 = vld [vmem:[#allocation5 + $0x588] ss:$16 sps:$4 sm:$0xff]  }
  0xa3   :  { %1473 = vmatpush2.bf16.msra.mxu1 %v2587_v7  ;;  %1396 = vmatprep.subr.bf16.mxu0 %v2598_v12  ;;  %v2682_v7 = vld [vmem:[#allocation5 + $0x34c] ss:$16 sps:$4 sm:$0xff]  }
  0xa4   :  { %1474 = vmatprep.subr.bf16.mxu1 %v2595_v11  ;;  %v2680_v11 = vld [vmem:[#allocation5 + $0x348] ss:$16 sps:$4 sm:$0xff]   ;;  %v2685_v12 = vld [vmem:[#allocation5 + $0x56c] ss:$16 sps:$4 sm:$0xff]  }
  0xa6   :  { %1397 = vmatpush2.bf16.msra.mxu0 %v2596_v14  ;;  %v2683_v14 = vld [vmem:[#allocation5 + $0x568] ss:$16 sps:$4 sm:$0xff]  }
  0xa7   :  { %1475 = vmatpush2.bf16.msra.mxu1 %v2593_v13  ;;  %1489 = vmatprep.subr.bf16.mxu0 %v2604_v18  ;;  %v2688_v13 = vld [vmem:[#allocation5 + $0x32c] ss:$16 sps:$4 sm:$0xff]  }
  0xa8   :  { %1476 = vmatprep.subr.bf16.mxu1 %v2601_v15  ;;  %v2686_v15 = vld [vmem:[#allocation5 + $0x328] ss:$16 sps:$4 sm:$0xff]   ;;  %v2694_v18 = vld [vmem:[#allocation5 + $0x30c] ss:$16 sps:$4 sm:$0xff]  }
  0xa9   :  { %1399 = vmatmul.mubr.bf16.vlgmr.msra.gmra.mxu0 %v2945_v21 }
  0xaa   :  { %1490 = vmatpush1.bf16.msra.mxu0 %v2602_v22  ;;  %1521 = vmatprep.mubr.bf16.mxu0 %v2926_v53  ;;  %v2626_v53 = vld [vmem:[#allocation5 + $0x268] ss:$16 sps:$4 sm:$0xff]  }
  0xab   :  { %1477 = vmatpush2.bf16.msra.mxu1 %v2599_v19  ;;  %1491 = vmatprep.subr.bf16.mxu0 %v2610_v24  ;;  %v2689_v19 = vld [vmem:[#allocation5 + $0x548] ss:$16 sps:$4 sm:$0xff]   ;;  %v2700_v24 = vld [vmem:[#allocation5 + $0x60c] ss:$16 sps:$4 sm:$0xff]  }
  0xac   :  { %1478 = vmatprep.subr.bf16.mxu1 %v2607_v23  ;;  %v2692_v22 = vld [vmem:[#allocation5 + $0x308] ss:$16 sps:$4 sm:$0xff]   ;;  %v2697_v23 = vld [vmem:[#allocation5 + $0x52c] ss:$16 sps:$4 sm:$0xff]  }
  0xae   :  { %1492 = vmatpush1.bf16.msra.mxu0 %v2608_v26  ;;  %v2698_v26 = vld [vmem:[#allocation5 + $0x608] ss:$16 sps:$4 sm:$0xff]  }
  0xaf   :  { %1479 = vmatpush2.bf16.msra.mxu1 %v2605_v25  ;;  %1493 = vmatprep.subr.bf16.mxu0 %v2616_v28  ;;  %v2695_v25 = vld [vmem:[#allocation5 + $0x528] ss:$16 sps:$4 sm:$0xff]   ;;  %v2706_v28 = vld [vmem:[#allocation7 + $0x74] ss:$8 sps:$4 sm:$0xff]  }
  0xb0   :  { %1530 = vmatprep.subr.bf16.mxu1 %v2613_v27  ;;  %v2703_v27 = vld [vmem:[#allocation5 + $0x50c] ss:$16 sps:$4 sm:$0xff]  }
  0xb2   :  { %1481 = vmatmul.mubr.bf16.vlgmr.msra.gmra.mxu1 %v2930_v9  ;;  %1494 = vmatpush1.bf16.msra.mxu0 %v2614_v30  ;;  %v2632_v9 = vld [vmem:[#allocation5 + $0x248] ss:$16 sps:$4 sm:$0xff]  }
  0xb3   :  { %1531 = vmatpush1.bf16.msra.mxu1 %v2611_v29  ;;  %1495 = vmatprep.subr.bf16.mxu0 %v2622_v32  ;;  %v2701_v29 = vld [vmem:[#allocation5 + $0x508] ss:$16 sps:$4 sm:$0xff]  }
  0xb4   :  { %1532 = vmatprep.subr.bf16.mxu1 %v2619_v31  ;;  %1562 = vmatprep.mubr.bf16.mxu1 %v2942_v37  ;;  %v2643_v37 = vld [vmem:[#allocation5 + $0x44c] ss:$16 sps:$4 sm:$0xff]   ;;  %v2704_v30 = vld [vmem:[#allocation7 + $0x70] ss:$8 sps:$4 sm:$0xff]   ;;  %v2707_v32 = vld [vmem:[#allocation7 + $0x60] ss:$8 sps:$4 sm:$0xff]  }
  0xb5   :  { %v2709_v31 = vld [vmem:[#allocation7 + $0x64] ss:$8 sps:$4 sm:$0xff]  }
  0xb6   :  { %1496 = vmatpush1.bf16.msra.mxu0 %v2620_v34  ;;  %v2715_v34 = vld [vmem:[#allocation7 + $0x44] ss:$8 sps:$4 sm:$0xff]  }
  0xb7   :  { %1533 = vmatpush1.bf16.msra.mxu1 %v2617_v33  ;;  %1497 = vmatprep.subr.bf16.mxu0 %v2628_v36  ;;  %v2712_v33 = vld [vmem:[#allocation7 + $0x54] ss:$8 sps:$4 sm:$0xff]  }
  0xb8   :  { %1534 = vmatprep.subr.bf16.mxu1 %v2625_v35  ;;  %v2752_v35 = vld [vmem:[#allocation7 + $0x170] ss:$8 sps:$4 sm:$0xff]   ;;  %v2754_v36 = vld [vmem:[#allocation7 + $0x174] ss:$8 sps:$4 sm:$0xff]  }
  0xba   :  { %1498 = vmatpush1.bf16.msra.mxu0 %v2626_v53  ;;  %v2755_v53 = vld [vmem:[#allocation7 + $0x160] ss:$8 sps:$4 sm:$0xff]  }
  0xbb   :  { %1535 = vmatpush1.bf16.msra.mxu1 %v2623_v38  ;;  %1499 = vmatprep.subr.bf16.mxu0 %v2634_v40  ;;  %v2713_v38 = vld [vmem:[#allocation7 + $0x40] ss:$8 sps:$4 sm:$0xff]   ;;  %v2758_v40 = vld [vmem:[#allocation7 + $0x150] ss:$8 sps:$4 sm:$0xff]  }
  0xbc   :  { %1536 = vmatprep.subr.bf16.mxu1 %v2631_v39  ;;  %v2716_v39 = vld [vmem:[#allocation7 + $0x30] ss:$8 sps:$4 sm:$0xff]  }
  0xbe   :  { %1500 = vmatpush1.bf16.msra.mxu0 %v2632_v9  ;;  %v2763_v9 = vld [vmem:[#allocation7 + $0x144] ss:$8 sps:$4 sm:$0xff]  }
  0xbf   :  { %1537 = vmatpush1.bf16.msra.mxu1 %v2629_v41  ;;  %1501 = vmatprep.subr.bf16.mxu0 %v2640_v43  ;;  %v2721_v41 = vld [vmem:[#allocation7 + $0x24] ss:$8 sps:$4 sm:$0xff]   ;;  %v2761_v43 = vld [vmem:[#allocation7 + $0x140] ss:$8 sps:$4 sm:$0xff]  }
  0xc0   :  { %1538 = vmatprep.subr.bf16.mxu1 %v2637_v42  ;;  %v2719_v42 = vld [vmem:[#allocation7 + $0x20] ss:$8 sps:$4 sm:$0xff]  }
  0xc2   :  { %1502 = vmatpush1.bf16.msra.mxu0 %v2638_v45  ;;  %v2766_v45 = vld [vmem:[#allocation7 + $0x134] ss:$8 sps:$4 sm:$0xff]  }
  0xc3   :  { %1539 = vmatpush1.bf16.msra.mxu1 %v2635_v44  ;;  %1503 = vmatprep.subr.bf16.mxu0 %v2646_v46  ;;  %v2724_v44 = vld [vmem:[#allocation7 + $0x14] ss:$8 sps:$4 sm:$0xff]   ;;  %v2764_v46 = vld [vmem:[#allocation7 + $0x130] ss:$8 sps:$4 sm:$0xff]  }
  0xc4   :  { %1540 = vmatprep.subr.bf16.mxu1 %v2643_v37  ;;  %v2722_v37 = vld [vmem:[#allocation7 + $0x10] ss:$8 sps:$4 sm:$0xff]  }
  0xc6   :  { %1504 = vmatpush1.bf16.msra.mxu0 %v2644_v48  ;;  %v2769_v48 = vld [vmem:[#allocation7 + $0x124] ss:$8 sps:$4 sm:$0xff]  }
  0xc7   :  { %1541 = vmatpush1.bf16.msra.mxu1 %v2641_v47  ;;  %1505 = vmatprep.subr.bf16.mxu0 %v2652_v50  ;;  %v2727_v47 = vld [vmem:[#allocation7 + $0x4] ss:$8 sps:$4 sm:$0xff]   ;;  %v2767_v50 = vld [vmem:[#allocation7 + $0x120] ss:$8 sps:$4 sm:$0xff]  }
  0xc8   :  { %1542 = vmatprep.subr.bf16.mxu1 %v2649_v49  ;;  %v2725_v49 = vld [vmem:[#allocation7] ss:$8 sps:$4 sm:$0xff]  }
  0xca   :  { %1506 = vmatpush2.bf16.msra.mxu0 %v2650_v52  ;;  %v2772_v52 = vld [vmem:[#allocation7 + $0x114] ss:$8 sps:$4 sm:$0xff]  }
  0xcb   :  { %1543 = vmatpush1.bf16.msra.mxu1 %v2647_v51  ;;  %1507 = vmatprep.subr.bf16.mxu0 %v2658_v55  ;;  %v2730_v51 = vld [vmem:[#allocation7 + $0xf4] ss:$8 sps:$4 sm:$0xff]   ;;  %v2770_v55 = vld [vmem:[#allocation7 + $0x110] ss:$8 sps:$4 sm:$0xff]  }
  0xcc   :  { %1544 = vmatprep.subr.bf16.mxu1 %v2655_v54  ;;  %v2728_v54 = vld [vmem:[#allocation7 + $0xf0] ss:$8 sps:$4 sm:$0xff]  }
  0xce   :  { %1508 = vmatpush2.bf16.msra.mxu0 %v2656_v57  ;;  %v2775_v57 = vld [vmem:[#allocation7 + $0x104] ss:$8 sps:$4 sm:$0xff]  }
  0xcf   :  { %1545 = vmatpush1.bf16.msra.mxu1 %v2653_v56  ;;  %1509 = vmatprep.subr.bf16.mxu0 %v2664_v59  ;;  %v2733_v56 = vld [vmem:[#allocation7 + $0xe4] ss:$8 sps:$4 sm:$0xff]   ;;  %v2773_v59 = vld [vmem:[#allocation7 + $0x100] ss:$8 sps:$4 sm:$0xff]  }
  0xd0   :  { %1546 = vmatprep.subr.bf16.mxu1 %v2661_v58  ;;  %v2731_v58 = vld [vmem:[#allocation7 + $0xe0] ss:$8 sps:$4 sm:$0xff]  }
  0xd2   :  { %1510 = vmatpush2.bf16.msra.mxu0 %v2662_v61  ;;  %v2778_v61 = vld [vmem:[#allocation7 + $0x1f4] ss:$8 sps:$4 sm:$0xff]  }
  0xd3   :  { %1547 = vmatpush2.bf16.msra.mxu1 %v2659_v60  ;;  %1511 = vmatprep.subr.bf16.mxu0 %v2670_v63  ;;  %v2736_v60 = vld [vmem:[#allocation7 + $0xd4] ss:$8 sps:$4 sm:$0xff]   ;;  %v2776_v63 = vld [vmem:[#allocation7 + $0x1f0] ss:$8 sps:$4 sm:$0xff]  }
  0xd4   :  { %1548 = vmatprep.subr.bf16.mxu1 %v2667_v62  ;;  %v2734_v62 = vld [vmem:[#allocation7 + $0xd0] ss:$8 sps:$4 sm:$0xff]  }
  0xd6   :  { %1512 = vmatpush2.bf16.msra.mxu0 %v2668_v1  ;;  %v2781_v1 = vld [vmem:[#allocation7 + $0x1e4] ss:$8 sps:$4 sm:$0xff]  }
  0xd7   :  { %1549 = vmatpush2.bf16.msra.mxu1 %v2665_v0  ;;  %1513 = vmatprep.subr.bf16.mxu0 %v2676_v3  ;;  %v2739_v0 = vld [vmem:[#allocation7 + $0xc4] ss:$8 sps:$4 sm:$0xff]   ;;  %v2779_v3 = vld [vmem:[#allocation7 + $0x1e0] ss:$8 sps:$4 sm:$0xff]  }
  0xd8   :  { %1550 = vmatprep.subr.bf16.mxu1 %v2673_v2  ;;  %v2737_v2 = vld [vmem:[#allocation7 + $0xc0] ss:$8 sps:$4 sm:$0xff]  }
  0xda   :  { %1514 = vmatpush2.bf16.msra.mxu0 %v2674_v5  ;;  %v2784_v5 = vld [vmem:[#allocation7 + $0x1d4] ss:$8 sps:$4 sm:$0xff]  }
  0xdb   :  { %1551 = vmatpush2.bf16.msra.mxu1 %v2671_v4  ;;  %1515 = vmatprep.subr.bf16.mxu0 %v2682_v7  ;;  %v2742_v4 = vld [vmem:[#allocation7 + $0xb4] ss:$8 sps:$4 sm:$0xff]   ;;  %v2782_v7 = vld [vmem:[#allocation7 + $0x1d0] ss:$8 sps:$4 sm:$0xff]  }
  0xdc   :  { %1552 = vmatprep.subr.bf16.mxu1 %v2679_v6  ;;  %v2740_v6 = vld [vmem:[#allocation7 + $0xb0] ss:$8 sps:$4 sm:$0xff]  }
  0xde   :  { %1516 = vmatpush2.bf16.msra.mxu0 %v2680_v11  ;;  %v2743_v11 = vld [vmem:[#allocation7 + $0xa0] ss:$8 sps:$4 sm:$0xff]  }
  0xdf   :  { %1553 = vmatpush2.bf16.msra.mxu1 %v2677_v8  ;;  %1517 = vmatprep.subr.bf16.mxu0 %v2688_v13  ;;  %v2745_v8 = vld [vmem:[#allocation7 + $0xa4] ss:$8 sps:$4 sm:$0xff]   ;;  %v2746_v13 = vld [vmem:[#allocation7 + $0x90] ss:$8 sps:$4 sm:$0xff]  }
  0xe0   :  { %1554 = vmatprep.subr.bf16.mxu1 %v2685_v12  ;;  %v2748_v12 = vld [vmem:[#allocation7 + $0x94] ss:$8 sps:$4 sm:$0xff]  }
  0xe2   :  { %1518 = vmatpush2.bf16.msra.mxu0 %v2686_v15 }
  0xe3   :  { %1555 = vmatpush2.bf16.msra.mxu1 %v2683_v14  ;;  %1519 = vmatprep.subr.bf16.mxu0 %v2694_v18  ;;  %v2751_v14 = vld [vmem:[#allocation7 + $0x84] ss:$8 sps:$4 sm:$0xff]  }
  0xe4   :  { %1556 = vmatprep.subr.bf16.mxu1 %v2691_v16  ;;  %v2787_v18 = vld [vmem:[#allocation7 + $0x1c4] ss:$8 sps:$4 sm:$0xff]  }
  0xe6   :  { %1520 = vmatpush2.bf16.msra.mxu0 %v2692_v22  ;;  %v2785_v22 = vld [vmem:[#allocation7 + $0x1c0] ss:$8 sps:$4 sm:$0xff]  }
  0xe7   :  { %1557 = vmatpush2.bf16.msra.mxu1 %v2689_v19  ;;  %1585 = vmatprep.subr.bf16.mxu0 %v2700_v24  ;;  %v2749_v19 = vld [vmem:[#allocation7 + $0x80] ss:$8 sps:$4 sm:$0xff]  }
  0xe8   :  { %1558 = vmatprep.subr.bf16.mxu1 %v2697_v23 }
  0xe9   :  { %1522 = vmatmul.mubr.bf16.vlgmr.msra.gmra.mxu0 %v2932_v10  ;;  %v2710_v10 = vld [vmem:[#allocation7 + $0x50] ss:$8 sps:$4 sm:$0xff]  }
  0xea   :  { %1586 = vmatpush1.bf16.msra.mxu0 %v2698_v26  ;;  %1603 = vmatprep.mubr.bf16.mxu0 %v2871_v17  ;;  %v2757_v17 = vld [vmem:[#allocation7 + $0x164] ss:$8 sps:$4 sm:$0xff]  }
  0xeb   :  { %1559 = vmatpush2.bf16.msra.mxu1 %v2695_v25  ;;  %2020 = vmatprep.subr.bf16.mxu0 %v2706_v28  ;;  %v2790_v28 = vld [vmem:[#allocation7 + $0x1b4] ss:$8 sps:$4 sm:$0xff]  }
  0xec   :  { %1560 = vmatprep.subr.bf16.mxu1 %v2703_v27  ;;  %v2788_v27 = vld [vmem:[#allocation7 + $0x1b0] ss:$8 sps:$4 sm:$0xff]  }
  0xef   :  { %1561 = vmatpush2.bf16.msra.mxu1 %v2701_v29 }
  0xf0   :  { %2061 = vmatprep.subr.bf16.mxu1 %v2754_v36  ;;  %v2794_v36 = vld [vmem:[#allocation7 + $0x190] ss:$8 sps:$4 sm:$0xff]  }
  0xf1   :  { %2336 = vmatmul.mubr.msk.bf16.vlgmr.msra.gmra.mxu0 %vm1280_vm0, %v2937_v20  ;;  %v2760_v20 = vld [vmem:[#allocation7 + $0x154] ss:$8 sps:$4 sm:$0xff]  }
  0xf2   :  { %1563 = vmatmul.mubr.bf16.vlgmr.msra.gmra.mxu1 %v2945_v21  ;;  %2021 = vmatpush1.bf16.msra.mxu0 %v2704_v30  ;;  %v2718_v21 = vld [vmem:[#allocation7 + $0x34] ss:$8 sps:$4 sm:$0xff]  }
  0xf3   :  { %2022 = vmatprep.subr.bf16.mxu0 %v2709_v31  ;;  %2062 = vmatpush1.bf16.msra.mxu1 %v2752_v35  ;;  %v2796_v35 = vld [vmem:[#allocation7 + $0x194] ss:$8 sps:$4 sm:$0xff]  }
  0xf4   :  { %2063 = vmatprep.subr.bf16.mxu1 %v2757_v17 }
  0xf6   :  { %2023 = vmatpush1.bf16.msra.mxu0 %v2707_v32  ;;  %v2793_v32 = vld [vmem:[#allocation7 + $0x1a4] ss:$8 sps:$4 sm:$0xff]  }
  0xf7   :  { %2024 = vmatprep.subr.bf16.mxu0 %v2712_v33  ;;  %2064 = vmatpush1.bf16.msra.mxu1 %v2755_v53  ;;  %v2791_v33 = vld [vmem:[#allocation7 + $0x1a0] ss:$8 sps:$4 sm:$0xff]  }
  0xf8   :  { %2065 = vmatprep.subr.bf16.mxu1 %v2760_v20  ;;  %v2797_v53 = vld [vmem:[#allocation7 + $0x180] ss:$8 sps:$4 sm:$0xff]  }
  0xfa   :  { %2025 = vmatpush1.bf16.msra.mxu0 %v2710_v10 }
  0xfb   :  { %2026 = vmatprep.subr.bf16.mxu0 %v2715_v34  ;;  %2066 = vmatpush1.bf16.msra.mxu1 %v2758_v40  ;;  %v278_v40 = vld [vmem:[%s2980_s2] sm:$0xf] }
  0xfc   :  { %2067 = vmatprep.subr.bf16.mxu1 %v2763_v9 }
  0xfe   :  { %2027 = vmatpush1.bf16.msra.mxu0 %v2713_v38  ;;  %v2799_v38 = vld [vmem:[#allocation7 + $0x184] ss:$8 sps:$4 sm:$0xff]  }
  0xff   :  { %2028 = vmatprep.subr.bf16.mxu0 %v2718_v21  ;;  %2068 = vmatpush1.bf16.msra.mxu1 %v2761_v43  ;;  %v280_v21 = vlaneseq }
 0x100   :  { %2069 = vmatprep.subr.bf16.mxu1 %v2766_v45 }
 0x101   :  { %v281_v20 = vshrl.u32 %v280_v21, 7 }
 0x102   :  { %2029 = vmatpush1.bf16.msra.mxu0 %v2716_v39 }
 0x103   :  { %2030 = vmatprep.subr.bf16.mxu0 %v2721_v41  ;;  %2070 = vmatpush1.bf16.msra.mxu1 %v2764_v46  ;;  %v2956_v39 = vsub.s32 0, %v281_v20  ;;  %v2961_v41 = vsub.s32 1, %v281_v20 }
 0x104   :  { %2071 = vmatprep.subr.bf16.mxu1 %v2769_v48 }
 0x105   :  { %v283_v9 = vrot.slane %v278_v40, %v2956_v39 }
 0x106   :  { %2031 = vmatpush1.bf16.msra.mxu0 %v2719_v42  ;;  %v287_v42 = vrot.slane %v278_v40, %v2961_v41 }
 0x107   :  { %2032 = vmatprep.subr.bf16.mxu0 %v2724_v44  ;;  %2072 = vmatpush1.bf16.msra.mxu1 %v2767_v50 }
 0x108   :  { %2073 = vmatprep.subr.bf16.mxu1 %v2772_v52 }
 0x10a   :  { %2033 = vmatpush1.bf16.msra.mxu0 %v2722_v37 }
 0x10b   :  { %2034 = vmatprep.subr.bf16.mxu0 %v2727_v47  ;;  %2074 = vmatpush1.bf16.msra.mxu1 %v2770_v55 }
 0x10c   :  { %2075 = vmatprep.subr.bf16.mxu1 %v2775_v57 }
 0x10e   :  { %2035 = vmatpush1.bf16.msra.mxu0 %v2725_v49 }
 0x10f   :  { %2036 = vmatprep.subr.bf16.mxu0 %v2730_v51  ;;  %2076 = vmatpush1.bf16.msra.mxu1 %v2773_v59 }
 0x110   :  { %2077 = vmatprep.subr.bf16.mxu1 %v2778_v61 }
 0x112   :  { %2037 = vmatpush2.bf16.msra.mxu0 %v2728_v54 }
 0x113   :  { %2038 = vmatprep.subr.bf16.mxu0 %v2733_v56  ;;  %2078 = vmatpush2.bf16.msra.mxu1 %v2776_v63 }
 0x114   :  { %2079 = vmatprep.subr.bf16.mxu1 %v2781_v1  ;;  %v290_v1 = vsub.s32 2, %v281_v20 }
 0x116   :  { %2039 = vmatpush2.bf16.msra.mxu0 %v2731_v58 }
 0x117   :  { %2040 = vmatprep.subr.bf16.mxu0 %v2736_v60  ;;  %2080 = vmatpush2.bf16.msra.mxu1 %v2779_v3 }
 0x118   :  { %2081 = vmatprep.subr.bf16.mxu1 %v2784_v5 }
 0x11a   :  { %2041 = vmatpush2.bf16.msra.mxu0 %v2734_v62 }
 0x11b   :  { %2042 = vmatprep.subr.bf16.mxu0 %v2739_v0  ;;  %2082 = vmatpush2.bf16.msra.mxu1 %v2782_v7 }
 0x11c   :  { %2083 = vmatprep.subr.bf16.mxu1 %v2787_v18 }
 0x11e   :  { %2043 = vmatpush2.bf16.msra.mxu0 %v2737_v2  ;;  %v294_v2 = vsub.s32 3, %v281_v20 }
 0x11f   :  { %2044 = vmatprep.subr.bf16.mxu0 %v2742_v4  ;;  %2084 = vmatpush2.bf16.msra.mxu1 %v2785_v22  ;;  %v291_v4 = vrot.slane %v278_v40, %v290_v1 }
 0x120   :  { %2085 = vmatprep.subr.bf16.mxu1 %v2790_v28 }
 0x122   :  { %2045 = vmatpush2.bf16.msra.mxu0 %v2740_v6  ;;  %v295_v6 = vrot.slane %v278_v40, %v294_v2 }
 0x123   :  { %2046 = vmatprep.subr.bf16.mxu0 %v2745_v8  ;;  %2086 = vmatpush2.bf16.msra.mxu1 %v2788_v27 }
 0x124   :  { %2087 = vmatprep.subr.bf16.mxu1 %v2793_v32 }
 0x126   :  { %2047 = vmatpush2.bf16.msra.mxu0 %v2743_v11 }
 0x127   :  { %2048 = vmatprep.subr.bf16.mxu0 %v2748_v12  ;;  %2088 = vmatpush2.bf16.msra.mxu1 %v2791_v33 }
 0x128   :  { %2089 = vmatprep.subr.bf16.mxu1 %v2796_v35 }
 0x129   :  { %v1318_v15 = vpop.f32.mrf.mxu0 }
 0x12a   :  { %v1359_v16 = vpop.f32.mrf.mxu1  ;;  %2049 = vmatpush2.bf16.msra.mxu0 %v2746_v13  ;;  %v1319_v43 = vadd.f32 %v1318_v15, %v283_v9 }
 0x12b   :  { %v1320_v23 = vpop.f32.mrf.mxu0  ;;  %2050 = vmatprep.subr.bf16.mxu0 %v2751_v14  ;;  %2090 = vmatpush2.bf16.msra.mxu1 %v2794_v36 }
 0x12c   :  { %v1361_v24 = vpop.f32.mrf.mxu1  ;;  %2091 = vmatprep.subr.bf16.mxu1 %v2799_v38  ;;  %v1321_v44 = vadd.f32 %v1320_v23, %v287_v42  ;;  %v1360_v45 = vadd.f32 %v1359_v16, %v1319_v43 }
 0x12d   :  { %v1322_v25 = vpop.f32.mrf.mxu0 }
 0x12e   :  { %v1363_v26 = vpop.f32.mrf.mxu1  ;;  %2051 = vmatpush2.bf16.msra.mxu0 %v2749_v19  ;;  %v1362_v46 = vadd.f32 %v1361_v24, %v1321_v44 }
 0x12f   :  { %v1323_v29 = vpop.f32.mrf.mxu0  ;;  %2092 = vmatpush2.bf16.msra.mxu1 %v2797_v53  ;;  %v1688_v53 = vld [vmem:[%s2982_s4] sm:$0x3] }
 0x130   :  { %v1364_v30 = vpop.f32.mrf.mxu1  ;;  %v1693_v21 = vrot.slane %v1688_v53, %v2956_v39  ;;  %v1697_v20 = vrot.slane %v1688_v53, %v2961_v41 }
 0x132   :  { %v1441_v31 = vpop.f32.mrf.mxu1 }
 0x134   :  { %v1443_v10 = vpop.f32.mrf.mxu1 }
 0x136   :  { %v1445_v34 = vpop.f32.mrf.mxu1 }
 0x138   :  { %v1446_v17 = vpop.f32.mrf.mxu1 }
 0x169   :  { %v1400_v37 = vpop.f32.mrf.mxu0 }
 0x16a   :  { %v1401_v47 = vadd.f32 %v1400_v37, %v1360_v45  ;;  %v2106_v45 = vld [vmem:[%s2983_s5] sm:$0x3] }
 0x16b   :  { %v1402_v48 = vpop.f32.mrf.mxu0 }
 0x16c   :  { %v1442_v49 = vadd.f32 %v1441_v31, %v1401_v47  ;;  %v1403_v50 = vadd.f32 %v1402_v48, %v1362_v46 }
 0x16d   :  { %v1404_v51 = vpop.f32.mrf.mxu0 }
 0x16e   :  { %v1612_v52 = vmul.f32 0.2, %v1442_v49  ;;  %v1444_v54 = vadd.f32 %v1443_v10, %v1403_v50  ;;  %v2111_v50 = vrot.slane %v2106_v45, %v2956_v39  ;;  %v2115_v51 = vrot.slane %v2106_v45, %v2961_v41 }
 0x16f   :  { %v1405_v55 = vpop.f32.mrf.mxu0 }
 0x170   :  { %v1613_v56 = vmul.f32 0.2, %v1444_v54  ;;  %v1616_v57 = vmax.f32 %v1442_v49, %v1612_v52 }
 0x172   :  { %v1482_v58 = vpop.f32.mrf.mxu1  ;;  %v1617_v59 = vmax.f32 %v1444_v54, %v1613_v56  ;;  %v1620_v62 = vpack.c.bf16 %v1616_v57, %v1616_v57 }
 0x173   :  { %v1483_v8 = vadd.f32 %v1482_v58, %v291_v4  ;;  %v2401_v58 = vld [vmem:[#allocation2] ss:$0 sm:$0xff] }
 0x174   :  { %v1484_v60 = vpop.f32.mrf.mxu1  ;;  %v1621_v61 = vpack.c.bf16 %v1617_v59, %v1617_v59 }
 0x175   :  { %v1485_v12 = vadd.f32 %v1484_v60, %v295_v6 }
 0x176   :  { %v1486_v63 = vpop.f32.mrf.mxu1  ;;  %2052 = vmatprep.mubr.bf16.mxu0 %v1621_v61 }
 0x177   :  { %2053 = vmatmul.mubr.bf16.vlgmr.msra.gmra.mxu0 %v1620_v62 }
 0x178   :  { %v1487_v0 = vpop.f32.mrf.mxu1 }
 0x1a9   :  { %v1523_v3 = vpop.f32.mrf.mxu0 }
 0x1aa   :  { %v1524_v13 = vadd.f32 %v1523_v3, %v1483_v8 }
 0x1ab   :  { %v1525_v5 = vpop.f32.mrf.mxu0 }
 0x1ac   :  { %v1526_v16 = vadd.f32 %v1525_v5, %v1485_v12 }
 0x1ad   :  { %v1527_v7 = vpop.f32.mrf.mxu0 }
 0x1af   :  { %v1528_v11 = vpop.f32.mrf.mxu0 }
 0x1b1   :  { %v1605_v15 = vpop.f32.mrf.mxu0 }
 0x1b2   :  { %v1564_v14 = vpop.f32.mrf.mxu1 }
 0x1b3   :  { %v1565_v18 = vadd.f32 %v1564_v14, %v1524_v13  ;;  %v1607_v22 = vpop.f32.mrf.mxu0 }
 0x1b4   :  { %v1566_v19 = vpop.f32.mrf.mxu1 }
 0x1b5   :  { %v1606_v23 = vadd.f32 %v1605_v15, %v1565_v18  ;;  %v1567_v24 = vadd.f32 %v1566_v19, %v1526_v16  ;;  %v1609_v26 = vpop.f32.mrf.mxu0 }
 0x1b6   :  { %v1568_v25 = vpop.f32.mrf.mxu1 }
 0x1b7   :  { %v1614_v27 = vmul.f32 0.2, %v1606_v23  ;;  %v1608_v28 = vadd.f32 %v1607_v22, %v1567_v24  ;;  %v1610_v30 = vpop.f32.mrf.mxu0 }
 0x1b8   :  { %v1569_v29 = vpop.f32.mrf.mxu1 }
 0x1b9   :  { %v1615_v31 = vmul.f32 0.2, %v1608_v28  ;;  %v1618_v32 = vmax.f32 %v1606_v23, %v1614_v27 }
 0x1bb   :  { %v1619_v33 = vmax.f32 %v1608_v28, %v1615_v31  ;;  %v1622_v34 = vpack.c.bf16 %v1618_v32, %v1618_v32 }
 0x1bd   :  { %v1623_v10 = vpack.c.bf16 %v1619_v33, %v1619_v33 }
 0x1bf   :  { %2093 = vmatprep.mubr.bf16.mxu1 %v1623_v10 }
 0x1c0   :  { %2094 = vmatmul.mubr.bf16.vlgmr.msra.gmra.mxu1 %v1622_v34 }
 0x237   :  { %v2054_v35 = vpop.f32.mrf.mxu0 }
 0x238   :  { %v2055_v40 = vadd.f32 %v2054_v35, %v1693_v21 }
 0x239   :  { %v2056_v36 = vpop.f32.mrf.mxu0 }
 0x23a   :  { %v2057_v42 = vadd.f32 %v2056_v36, %v1697_v20 }
 0x23b   :  { %v2058_v17 = vpop.f32.mrf.mxu0 }
 0x23d   :  { %v2059_v38 = vpop.f32.mrf.mxu0 }
 0x280   :  { %v2095_v9 = vpop.f32.mrf.mxu1 }
 0x281   :  { %v2096_v43 = vadd.f32 %v2095_v9, %v2055_v40 }
 0x282   :  { %v2097_v44 = vpop.f32.mrf.mxu1 }
 0x283   :  { %v2102_v37 = vmul.f32 0.2, %v2096_v43  ;;  %v2098_v46 = vadd.f32 %v2097_v44, %v2057_v42 }
 0x284   :  { %v2099_v47 = vpop.f32.mrf.mxu1 }
 0x285   :  { %v2104_v48 = vmax.f32 %v2096_v43, %v2102_v37  ;;  %v2103_v49 = vmul.f32 0.2, %v2098_v46 }
 0x286   :  { %v2100_v52 = vpop.f32.mrf.mxu1 }
 0x287   :  { %v2105_v54 = vmax.f32 %v2098_v46, %v2103_v49  ;;  %v2118_v55 = vmul.f32 %v2111_v50, %v2104_v48 }
 0x289   :  { %v2119_v56 = vmul.f32 %v2115_v51, %v2105_v54 }
 0x28b   :  { %v2120_v57 = vadd.f32 %v2119_v56, %v2118_v55 }
 0x28d   :  { %2121 = vadd.xlane.f32.xlu0 %v2120_v57 }
 0x316   :  { %v2122_v59 = vpop.xlane.xlu0 %2121 }
 0x317   :  { %v2130_v60 = vadd.f32 %v2401_v58, %v2122_v59 }
 0x319   :  { %2132 = vst.msk [vmem:[%s2985_s7] sm:$0xff] %vm2131_vm1, %v2130_v60 }
 0x31a   :  { %2137 = vsyncpa [#allocation4], 1 }
 0x31b   :  { %2138 = vsyncpa [#allocation6], 1 }

</bundles_post_ra>
